<compile_context>
chip_gen: v7x
topology: tpu7x:2x2x1
jax: 0.10.0
libtpu: 0.0.40
codegen_flags: <defaults>
</compile_context>

<pallas_src>
import functools

import numpy as np
import jax
import jax.numpy as jnp
from jax import lax
from jax.experimental import pallas as pl
from jax.experimental.pallas import tpu as pltpu

NEG_BIG = -1e30  # finite python-float sentinel (-inf would NaN the rescale paths)


def _round_up(x, m):
    return (x + m - 1) // m * m


def _soft_agg_kernel(x_ref, jx_ref, wfg_ref, bfg_ref, wh_ref, bh_ref,
                     hy_ref, m_sc, acc_sc, *, gp):
    """Grid = (B, num_N_tiles); the N tiles form the trailing reduction axis.

    Element-major layout: elements n on sublanes, groups g / projection
    columns on lanes, so nothing needs a skinny transpose.
      proj (tn, DP): columns [ g(x) | 1 | f(x)_0..D-1 | 0-pad ]
      acc  (DP, gp): row 0 unused, row 1 = softmax denominator,
                     rows 2..D+1 = softmax-weighted sum of f(x).
    """
    k = pl.program_id(1)
    tn = x_ref.shape[1]

    @pl.when(k == 0)
    def _init():
        m_sc[...] = jnp.full(m_sc.shape, NEG_BIG, m_sc.dtype)
        acc_sc[...] = jnp.zeros_like(acc_sc)

    # Fused f/g projection on the MXU: bf16 inputs, f32 accumulation.
    xb = x_ref[0].astype(jnp.bfloat16)                       # (tn, D)
    proj = (jnp.dot(xb, wfg_ref[...], preferred_element_type=jnp.float32)
            + bfg_ref[...])                                  # (tn, DP) f32

    # Group membership rebuilt in-kernel (no dense one-hot from HBM).
    gids = lax.broadcasted_iota(jnp.int32, (tn, gp), 1)      # (tn, gp)
    member = gids == jx_ref[...]                             # (tn, gp) bool

    s = proj[:, 0:1]                                         # g(x)   (tn, 1)
    masked = jnp.where(member, s, NEG_BIG)                   # (tn, gp) f32

    # Flash-style online per-group max across the N tiles (all f32).
    m_prev = m_sc[...]                                       # (1, gp)
    m_new = jnp.maximum(m_prev, jnp.max(masked, axis=0, keepdims=True))
    alpha = jnp.exp(m_prev - m_new)                          # rescale old sums

    # Per-(element, group) softmax numerators.
    # TODO(synk): for very large G a group-max gather matmul would trade these
    # gp*tn exps for an extra skinny MXU pass; for DPVO-sized G the EUP slot
    # absorbs them for free.
    p = jnp.where(member, jnp.exp(masked - m_new), 0.0)      # (tn, gp)

    # Single bf16 scatter contraction: proj^T @ p -> [ * | sum p | sum f*p ].
    contrib = lax.dot_general(
        proj.astype(jnp.bfloat16), p.astype(jnp.bfloat16),
        dimension_numbers=(((0,), (0,)), ((), ())),
        preferred_element_type=jnp.float32)                  # (DP, gp)

    acc_sc[...] = alpha * acc_sc[...] + contrib
    m_sc[...] = m_new

    @pl.when(k == pl.num_programs(1) - 1)
    def _finalize():
        acc = acc_sc[...]                                    # (DP, gp)
        den = acc[1:2, :]                                    # softmax denom (1, gp)
        # Empty / padded groups have den == 0 -> emit h(0) = bh, never NaN.
        inv = jnp.where(den > 0.0, pl.reciprocal(den, approx=True), 0.0)
        y = acc * inv                                        # (DP, gp)
        # h(y): the g / denominator / pad rows of wh are zero, so only the
        # f(x) block contributes.  f32, runs once per batch element.
        hy = lax.dot_general(y, wh_ref[...],
                             dimension_numbers=(((0,), (0,)), ((), ())),
                             preferred_element_type=jnp.float32)   # (gp, DO)
        hy_ref[0] = (hy + bh_ref[...]).astype(hy_ref.dtype)


def _expand_kernel(jx_ref, hy_ref, out_ref, *, gp):
    """out[n] = h(y)[group(n)] as an exact f32 one-hot matmul (memory-bound)."""
    tn = jx_ref.shape[0]
    gids = lax.broadcasted_iota(jnp.int32, (tn, gp), 1)
    oh = (gids == jx_ref[...]).astype(jnp.float32)           # (tn, gp)
    out_ref[0] = jnp.dot(oh, hy_ref[0],
                         preferred_element_type=jnp.float32).astype(out_ref.dtype)


def _pick_tile_n(n, target):
    if n <= target:
        return n
    t = (target // 128) * 128
    while t >= 128:
        if n % t == 0:
            return t
        t -= 128
    # TODO(synk): pad N with masked rows instead of a whole-N fallback tile.
    return n


def soft_agg_basic(x, ix, params, *, expand=True, tile_n=None,
                   group_ids=None, num_groups=None):
    """SoftAggBasic forward. Returns (B, N, D) if expand else (B, G, D)."""
    wf, bf, wg, bg, wh, bh = params
    B, N, D = x.shape

    if group_ids is None or num_groups is None:
        # TODO(synk): this host-side unique forces a device->host sync and a
        # recompile whenever G changes; in a real DPVO loop pass precomputed
        # `group_ids` (values in [0, num_groups)) with a static `num_groups`.
        _, jx_np = np.unique(np.asarray(ix), return_inverse=True)
        G = int(jx_np.max()) + 1
    else:
        jx_np = np.asarray(group_ids)
        G = int(num_groups)
    Gp = _round_up(max(G, 1), 8)
    jx = jnp.asarray(np.asarray(jx_np).reshape(N, 1).astype(np.int32))  # (N, 1)

    DP = _round_up(D + 2, 128)        # projection width [g | 1 | f | pad]
    DO = _round_up(D, 128)            # lane-dense output width

    # Fused f/g projection weights (bf16); bias stays f32 (added post-matmul).
    wfg = np.zeros((D, DP), np.float32)
    wfg[:, 0] = np.asarray(wg, np.float32)[:, 0]
    wfg[:, 2:D + 2] = np.asarray(wf, np.float32)
    bfg = np.zeros((1, DP), np.float32)
    bfg[0, 0] = float(np.asarray(bg, np.float32)[0, 0])
    bfg[0, 1] = 1.0                                   # constant "1" column
    bfg[0, 2:D + 2] = np.asarray(bf, np.float32)[0]
    wfg = jnp.asarray(wfg, dtype=jnp.bfloat16)
    bfg = jnp.asarray(bfg)

    # h weights padded so the accumulator's g / denominator / pad rows vanish.
    wh_p = np.zeros((DP, DO), np.float32)
    wh_p[2:D + 2, :D] = np.asarray(wh, np.float32)
    bh_p = np.zeros((1, DO), np.float32)
    bh_p[0, :D] = np.asarray(bh, np.float32)[0]
    wh_p = jnp.asarray(wh_p)
    bh_p = jnp.asarray(bh_p)

    # Generation-aware tiling / VMEM scope (v5e/v6e: 128 MiB, v7x: 64 MiB).
    try:
        vmem_cap = int(pltpu.get_tpu_info().vmem_capacity_bytes)
    except Exception:
        vmem_cap = 64 * 1024 * 1024
    vmem_limit = min(vmem_cap * 3 // 4, 100 * 1024 * 1024)
    if tile_n is None:
        tile_n = _pick_tile_n(N, 1024 if vmem_cap >= 100 * 1024 * 1024 else 512)
    if tile_n != N:
        assert N % tile_n == 0 and tile_n % 128 == 0, (
            "tile_n must divide N and be a multiple of 128 (or equal N)")
    nt = N // tile_n
    grid = (B, nt)
    # TODO(synk): for B == 1 on v7x, additionally split the N reduction across
    # the two TensorCores (partial accumulators + a tiny combine kernel).

    hy = pl.pallas_call(
        functools.partial(_soft_agg_kernel, gp=Gp),
        out_shape=jax.ShapeDtypeStruct((B, Gp, DO), jnp.float32),
        grid_spec=pltpu.PrefetchScalarGridSpec(
            num_scalar_prefetch=0,
            grid=grid,
            in_specs=[
                pl.BlockSpec((1, tile_n, D), lambda b, k: (b, k, 0)),   # x
                pl.BlockSpec((tile_n, 1), lambda b, k: (k, 0)),         # group ids
                pl.BlockSpec((D, DP), lambda b, k: (0, 0)),             # [wg|0|wf]
                pl.BlockSpec((1, DP), lambda b, k: (0, 0)),             # [bg|1|bf]
                pl.BlockSpec((DP, DO), lambda b, k: (0, 0)),            # wh (padded)
                pl.BlockSpec((1, DO), lambda b, k: (0, 0)),             # bh (padded)
            ],
            out_specs=pl.BlockSpec((1, Gp, DO), lambda b, k: (b, 0, 0)),
            scratch_shapes=[
                pltpu.VMEM((1, Gp), jnp.float32),      # running per-group max
                pltpu.VMEM((DP, Gp), jnp.float32),     # [*, denom, numerators]
            ]),
        compiler_params=pltpu.CompilerParams(
            dimension_semantics=("parallel", "arbitrary"),
            vmem_limit_bytes=vmem_limit),
    )(x, jx, wfg, bfg, wh_p, bh_p)

    if not expand:
        return hy[:, :G, :D]                          # drop group / lane padding

    out = pl.pallas_call(
        functools.partial(_expand_kernel, gp=Gp),
        out_shape=jax.ShapeDtypeStruct((B, N, DO), jnp.float32),
        grid_spec=pltpu.PrefetchScalarGridSpec(
            num_scalar_prefetch=0,
            grid=grid,
            in_specs=[
                pl.BlockSpec((tile_n, 1), lambda b, k: (k, 0)),         # group ids
                pl.BlockSpec((1, Gp, DO), lambda b, k: (b, 0, 0)),      # h(y)
            ],
            out_specs=pl.BlockSpec((1, tile_n, DO), lambda b, k: (b, k, 0))),
        compiler_params=pltpu.CompilerParams(
            dimension_semantics=("parallel", "parallel"),
            vmem_limit_bytes=vmem_limit),
    )(jx, hy)
    return out[:, :, :D]                              # drop lane padding


# ------------------------------ test harness ---------------------------------
def _reference(x, ix, params, expand):
    wf, bf, wg, bg, wh, bh = [np.asarray(p, np.float32) for p in params]
    x = np.asarray(x, np.float32)
    _, jx = np.unique(np.asarray(ix), return_inverse=True)
    G = int(jx.max()) + 1
    fx = x @ wf + bf
    s = (x @ wg + bg)[..., 0]
    w = np.zeros_like(s)
    for g in range(G):
        m = jx == g
        sg = s[:, m] - s[:, m].max(axis=1, keepdims=True)
        eg = np.exp(sg)
        w[:, m] = eg / eg.sum(axis=1, keepdims=True)
    z = fx * w[..., None]
    y = np.stack([z[:, jx == g].sum(axis=1) for g in range(G)], axis=1)
    hy = y @ wh + bh
    return hy[:, jx] if expand else hy


def _make_inputs(key, B, N, D, n_labels):
    ks = jax.random.split(key, 8)
    x = jax.random.normal(ks[0], (B, N, D), dtype=jnp.float32)
    ix = jax.random.randint(ks[1], (N,), 0, n_labels, dtype=jnp.int32)
    wf = 0.1 * jax.random.normal(ks[2], (D, D), dtype=jnp.float32)
    bf = 0.1 * jax.random.normal(ks[3], (1, D), dtype=jnp.float32)
    wg = 0.1 * jax.random.normal(ks[4], (D, 1), dtype=jnp.float32)
    bg = 0.1 * jax.random.normal(ks[5], (1, 1), dtype=jnp.float32)
    wh = 0.1 * jax.random.normal(ks[6], (D, D), dtype=jnp.float32)
    bh = 0.1 * jax.random.normal(ks[7], (1, D), dtype=jnp.float32)
    return x, ix, (wf, bf, wg, bg, wh, bh)


if __name__ == "__main__":
    # bf16 matmul path -> compare against the f32 numpy reference with a
    # correspondingly loose (but bug-catching) tolerance.
    RTOL = ATOL = 2e-2

    # 1) Small shapes, non-contiguous group labels, expand=True (default path).
    B, N, D = 2, 8, 32
    x, _, params = _make_inputs(jax.random.PRNGKey(0), B, N, D, 4)
    ix = jnp.array([3, 3, 7, 1, 1, 7, 3, 0], dtype=jnp.int32)
    out = jax.block_until_ready(soft_agg_basic(x, ix, params, expand=True))
    np.testing.assert_allclose(np.asarray(out), _reference(x, ix, params, True),
                               rtol=RTOL, atol=ATOL)

    # 2) expand=False path (grouped output only; no gather kernel launched).
    out_g = jax.block_until_ready(soft_agg_basic(x, ix, params, expand=False))
    np.testing.assert_allclose(np.asarray(out_g),
                               _reference(x, ix, params, False),
                               rtol=RTOL, atol=ATOL)

    # 3) Multi N-tile grid: exercises the online scatter-softmax accumulator.
    B, N, D = 2, 256, 32
    x, ix, params = _make_inputs(jax.random.PRNGKey(1), B, N, D, 10)
    out = jax.block_until_ready(
        soft_agg_basic(x, ix, params, expand=True, tile_n=128))
    np.testing.assert_allclose(np.asarray(out), _reference(x, ix, params, True),
                               rtol=RTOL, atol=ATOL)

    print("KERNEL_OK")
</pallas_src>

<mosaic_0001>
module attributes {stable_mosaic.version = 11 : i64} {
  func.func @_soft_agg_kernel(%arg0: i32, %arg1: i32, %arg2: memref<1x8x32xf32, #tpu.memory_space<vmem>>, %arg3: memref<8x1xi32, #tpu.memory_space<vmem>>, %arg4: memref<32x128xbf16, #tpu.memory_space<vmem>>, %arg5: memref<1x128xf32, #tpu.memory_space<vmem>>, %arg6: memref<128x128xf32, #tpu.memory_space<vmem>>, %arg7: memref<1x128xf32, #tpu.memory_space<vmem>>, %arg8: memref<1x8x128xf32, #tpu.memory_space<vmem>>, %arg9: memref<1x8xf32, #tpu.memory_space<vmem>>, %arg10: memref<128x8xf32, #tpu.memory_space<vmem>>) attributes {dimension_semantics = [#tpu.dimension_semantics<parallel>, #tpu.dimension_semantics<arbitrary>], iteration_bounds = array<i64: 2, 1>, scalar_prefetch = 0 : i64, scratch_operands = 2 : i64, tpu.core_type = #tpu.core_type<tc>, window_params = [{transform_indices = @transform_0, window_bounds = array<i64: 1, 8, 32>}, {transform_indices = @transform_1, window_bounds = array<i64: 8, 1>}, {pipeline_mode = #tpu.pipeline_mode<synchronous>, transform_indices = @transform_2, window_bounds = array<i64: 32, 128>}, {pipeline_mode = #tpu.pipeline_mode<synchronous>, transform_indices = @transform_3, window_bounds = array<i64: 1, 128>}, {pipeline_mode = #tpu.pipeline_mode<synchronous>, transform_indices = @transform_4, window_bounds = array<i64: 128, 128>}, {pipeline_mode = #tpu.pipeline_mode<synchronous>, transform_indices = @transform_5, window_bounds = array<i64: 1, 128>}, {transform_indices = @transform_6, window_bounds = array<i64: 1, 8, 128>}]} {
    %c0_i32 = arith.constant 0 : i32
    %0 = arith.cmpi eq, %arg1, %c0_i32 : i32
    %1 = arith.extui %0 : i1 to i32
    %c0_i32_0 = arith.constant 0 : i32
    %2 = arith.cmpi ne, %1, %c0_i32_0 : i32
    scf.if %2 {
      %cst_23 = arith.constant -1.000000e+30 : f32
      %43 = vector.broadcast %cst_23 : f32 to vector<1x8xf32>
      %c0_24 = arith.constant 0 : index
      %c0_25 = arith.constant 0 : index
      %44 = vector.load %arg9[%c0_24, %c0_25] : memref<1x8xf32, #tpu.memory_space<vmem>>, vector<1x8xf32>
      tpu.vector_store %arg9[%c0_24, %c0_25], %43 {strides = array<i32>} : memref<1x8xf32, #tpu.memory_space<vmem>>, vector<1x8xf32>,
      %cst_26 = arith.constant 0.000000e+00 : f32
      %45 = vector.broadcast %cst_26 : f32 to vector<128x8xf32>
      %c0_27 = arith.constant 0 : index
      %c0_28 = arith.constant 0 : index
      %46 = vector.load %arg10[%c0_27, %c0_28] : memref<128x8xf32, #tpu.memory_space<vmem>>, vector<128x8xf32>
      tpu.vector_store %arg10[%c0_27, %c0_28], %45 {strides = array<i32>} : memref<128x8xf32, #tpu.memory_space<vmem>>, vector<128x8xf32>,
    } else {
    }
    %c0 = arith.constant 0 : index
    %c0_1 = arith.constant 0 : index
    %c0_2 = arith.constant 0 : index
    %3 = vector.load %arg2[%c0, %c0_1, %c0_2] : memref<1x8x32xf32, #tpu.memory_space<vmem>>, vector<1x8x32xf32>
    %4 = vector.shape_cast %3 : vector<1x8x32xf32> to vector<8x32xf32>
    %5 = arith.truncf %4 : vector<8x32xf32> to vector<8x32xbf16>
    %c0_3 = arith.constant 0 : index
    %c0_4 = arith.constant 0 : index
    %6 = vector.load %arg4[%c0_3, %c0_4] : memref<32x128xbf16, #tpu.memory_space<vmem>>, vector<32x128xbf16>
    %cst = arith.constant dense<0.000000e+00> : vector<8x128xf32>
    %7 = tpu.matmul %5, %6, %cst {dimension_numbers = #tpu.dot_dimension_numbers<[1], [0], [0], [1], [0, 0, 1, 1], [], []>} : vector<8x32xbf16>, vector<32x128xbf16>, vector<8x128xf32> -> vector<8x128xf32>
    %c0_5 = arith.constant 0 : index
    %c0_6 = arith.constant 0 : index
    %8 = vector.load %arg5[%c0_5, %c0_6] : memref<1x128xf32, #tpu.memory_space<vmem>>, vector<1x128xf32>
    %9 = vector.broadcast %8 : vector<1x128xf32> to vector<8x128xf32>
    %10 = arith.addf %7, %9 : vector<8x128xf32>
    %11 = tpu.iota {dimensions = array<i32: 1>} : vector<8x8xi32>
    %c0_7 = arith.constant 0 : index
    %c0_8 = arith.constant 0 : index
    %12 = vector.load %arg3[%c0_7, %c0_8] : memref<8x1xi32, #tpu.memory_space<vmem>>, vector<8x1xi32>
    %13 = vector.broadcast %12 : vector<8x1xi32> to vector<8x8xi32>
    %14 = arith.cmpi eq, %11, %13 : vector<8x8xi32>
    %15 = vector.extract_strided_slice %10 {offsets = [0, 0], sizes = [8, 1], strides = [1, 1]} : vector<8x128xf32> to vector<8x1xf32>
    %cst_9 = arith.constant -1.000000e+30 : f32
    %16 = vector.shape_cast %15 : vector<8x1xf32> to vector<8x1xf32>
    %17 = vector.broadcast %16 : vector<8x1xf32> to vector<8x8xf32>
    %18 = vector.broadcast %cst_9 : f32 to vector<8x8xf32>
    %19 = arith.select %14, %17, %18 : vector<8x8xi1>, vector<8x8xf32>
    %c0_10 = arith.constant 0 : index
    %c0_11 = arith.constant 0 : index
    %20 = vector.load %arg9[%c0_10, %c0_11] : memref<1x8xf32, #tpu.memory_space<vmem>>, vector<1x8xf32>
    %cst_12 = arith.constant dense<0xFF800000> : vector<8xf32>
    %21 = vector.multi_reduction <maximumf>, %19, %cst_12 [0] : vector<8x8xf32> to vector<8xf32>
    %22 = vector.shape_cast %21 : vector<8xf32> to vector<1x8xf32>
    %23 = arith.maximumf %20, %22 : vector<1x8xf32>
    %24 = arith.subf %20, %23 : vector<1x8xf32>
    %25 = math.exp %24 : vector<1x8xf32>
    %26 = vector.broadcast %23 : vector<1x8xf32> to vector<8x8xf32>
    %27 = arith.subf %19, %26 : vector<8x8xf32>
    %28 = math.exp %27 : vector<8x8xf32>
    %cst_13 = arith.constant 0.000000e+00 : f32
    %29 = vector.broadcast %cst_13 : f32 to vector<8x8xf32>
    %30 = arith.select %14, %28, %29 : vector<8x8xi1>, vector<8x8xf32>
    %31 = arith.truncf %10 : vector<8x128xf32> to vector<8x128xbf16>
    %32 = arith.truncf %30 : vector<8x8xf32> to vector<8x8xbf16>
    %cst_14 = arith.constant dense<0.000000e+00> : vector<128x8xf32>
    %33 = tpu.matmul %31, %32, %cst_14 {dimension_numbers = #tpu.dot_dimension_numbers<[0], [0], [1], [1], [0, 1, 1, 1], [], []>} : vector<8x128xbf16>, vector<8x8xbf16>, vector<128x8xf32> -> vector<128x8xf32>
    %c0_15 = arith.constant 0 : index
    %c0_16 = arith.constant 0 : index
    %34 = vector.load %arg10[%c0_15, %c0_16] : memref<128x8xf32, #tpu.memory_space<vmem>>, vector<128x8xf32>
    %35 = vector.broadcast %25 : vector<1x8xf32> to vector<128x8xf32>
    %36 = arith.mulf %35, %34 : vector<128x8xf32>
    %37 = arith.addf %36, %33 : vector<128x8xf32>
    %c0_17 = arith.constant 0 : index
    %c0_18 = arith.constant 0 : index
    %38 = vector.load %arg10[%c0_17, %c0_18] : memref<128x8xf32, #tpu.memory_space<vmem>>, vector<128x8xf32>
    tpu.vector_store %arg10[%c0_17, %c0_18], %37 {strides = array<i32>} : memref<128x8xf32, #tpu.memory_space<vmem>>, vector<128x8xf32>,
    %c0_19 = arith.constant 0 : index
    %c0_20 = arith.constant 0 : index
    %39 = vector.load %arg9[%c0_19, %c0_20] : memref<1x8xf32, #tpu.memory_space<vmem>>, vector<1x8xf32>
    tpu.vector_store %arg9[%c0_19, %c0_20], %23 {strides = array<i32>} : memref<1x8xf32, #tpu.memory_space<vmem>>, vector<1x8xf32>,
    %c0_i32_21 = arith.constant 0 : i32
    %40 = arith.cmpi eq, %arg1, %c0_i32_21 : i32
    %41 = arith.extui %40 : i1 to i32
    %c0_i32_22 = arith.constant 0 : i32
    %42 = arith.cmpi ne, %41, %c0_i32_22 : i32
    scf.if %42 {
      %c0_23 = arith.constant 0 : index
      %c0_24 = arith.constant 0 : index
      %43 = vector.load %arg10[%c0_23, %c0_24] : memref<128x8xf32, #tpu.memory_space<vmem>>, vector<128x8xf32>
      %44 = vector.extract_strided_slice %43 {offsets = [1, 0], sizes = [1, 8], strides = [1, 1]} : vector<128x8xf32> to vector<1x8xf32>
      %cst_25 = arith.constant 0.000000e+00 : f32
      %45 = vector.broadcast %cst_25 : f32 to vector<1x8xf32>
      %46 = arith.cmpf ogt, %44, %45 : vector<1x8xf32>
      %47 = tpu.reciprocal %44 {approx = true} : vector<1x8xf32> -> vector<1x8xf32>
      %cst_26 = arith.constant 0.000000e+00 : f32
      %48 = vector.broadcast %cst_26 : f32 to vector<1x8xf32>
      %49 = arith.select %46, %47, %48 : vector<1x8xi1>, vector<1x8xf32>
      %50 = vector.broadcast %49 : vector<1x8xf32> to vector<128x8xf32>
      %51 = arith.mulf %43, %50 : vector<128x8xf32>
      %c0_27 = arith.constant 0 : index
      %c0_28 = arith.constant 0 : index
      %52 = vector.load %arg6[%c0_27, %c0_28] : memref<128x128xf32, #tpu.memory_space<vmem>>, vector<128x128xf32>
      %cst_29 = arith.constant dense<0.000000e+00> : vector<8x128xf32>
      %53 = tpu.matmul %51, %52, %cst_29 {dimension_numbers = #tpu.dot_dimension_numbers<[0], [0], [1], [1], [0, 1, 1, 1], [], []>} : vector<128x8xf32>, vector<128x128xf32>, vector<8x128xf32> -> vector<8x128xf32>
      %c0_30 = arith.constant 0 : index
      %c0_31 = arith.constant 0 : index
      %54 = vector.load %arg7[%c0_30, %c0_31] : memref<1x128xf32, #tpu.memory_space<vmem>>, vector<1x128xf32>
      %55 = vector.broadcast %54 : vector<1x128xf32> to vector<8x128xf32>
      %56 = arith.addf %53, %55 : vector<8x128xf32>
      %c0_32 = arith.constant 0 : index
      %c0_33 = arith.constant 0 : index
      %c0_34 = arith.constant 0 : index
      %57 = vector.load %arg8[%c0_32, %c0_33, %c0_34] : memref<1x8x128xf32, #tpu.memory_space<vmem>>, vector<1x8x128xf32>
      %58 = vector.shape_cast %57 : vector<1x8x128xf32> to vector<8x128xf32>
      %59 = vector.shape_cast %56 : vector<8x128xf32> to vector<1x8x128xf32>
      tpu.vector_store %arg8[%c0_32, %c0_33, %c0_34], %59 {strides = array<i32>} : memref<1x8x128xf32, #tpu.memory_space<vmem>>, vector<1x8x128xf32>,
    } else {
    }
    return
  }
  func.func @transform_0(%arg0: i32, %arg1: i32) -> (i32, i32, i32) {
    %c0_i32 = arith.constant 0 : i32
    %c0_i32_0 = arith.constant 0 : i32
    return %arg0, %arg1, %c0_i32 : i32, i32, i32
  }
  func.func @transform_1(%arg0: i32, %arg1: i32) -> (i32, i32) {
    %c0_i32 = arith.constant 0 : i32
    %c0_i32_0 = arith.constant 0 : i32
    return %arg1, %c0_i32 : i32, i32
  }
  func.func @transform_2(%arg0: i32, %arg1: i32) -> (i32, i32) {
    %c0_i32 = arith.constant 0 : i32
    %c0_i32_0 = arith.constant 0 : i32
    %c0_i32_1 = arith.constant 0 : i32
    return %c0_i32, %c0_i32_0 : i32, i32
  }
  func.func @transform_3(%arg0: i32, %arg1: i32) -> (i32, i32) {
    %c0_i32 = arith.constant 0 : i32
    %c0_i32_0 = arith.constant 0 : i32
    %c0_i32_1 = arith.constant 0 : i32
    return %c0_i32, %c0_i32_0 : i32, i32
  }
  func.func @transform_4(%arg0: i32, %arg1: i32) -> (i32, i32) {
    %c0_i32 = arith.constant 0 : i32
    %c0_i32_0 = arith.constant 0 : i32
    %c0_i32_1 = arith.constant 0 : i32
    return %c0_i32, %c0_i32_0 : i32, i32
  }
  func.func @transform_5(%arg0: i32, %arg1: i32) -> (i32, i32) {
    %c0_i32 = arith.constant 0 : i32
    %c0_i32_0 = arith.constant 0 : i32
    %c0_i32_1 = arith.constant 0 : i32
    return %c0_i32, %c0_i32_0 : i32, i32
  }
  func.func @transform_6(%arg0: i32, %arg1: i32) -> (i32, i32, i32) {
    %c0_i32 = arith.constant 0 : i32
    %c0_i32_0 = arith.constant 0 : i32
    %c0_i32_1 = arith.constant 0 : i32
    return %arg0, %c0_i32, %c0_i32_0 : i32, i32, i32
  }
}

</mosaic_0001>

<bundles_post_ra>
// kernel: tpu_custom_call.1
= control target key start
LH: loop header
LB: loop body
LE: loop exit
PB: predicated region body
PF: predicated region fallthrough
CT: control target
= control target key end

     0   :  { %s1690_s0 = inlined_call_operand.hbm [shape: f32[2,8,32], index: 0, kind: input, shape index: {}]   ;;  %s1691_s1 = inlined_call_operand.vmem [shape: s32[8,1], index: 1, kind: input, shape index: {}]   ;;  %s1692_s2 = inlined_call_operand.vmem [shape: bf16[32,128], index: 2, kind: input, shape index: {}]   ;;  %s1693_s3 = inlined_call_operand.vmem [shape: f32[1,128], index: 3, kind: input, shape index: {}]   ;;  %s1694_s4 = inlined_call_operand.hbm [shape: f32[128,128], index: 4, kind: input, shape index: {}]   ;;  %s1695_s5 = inlined_call_operand.vmem [shape: f32[1,128], index: 5, kind: input, shape index: {}]   ;;  %s1696_s6 = inlined_call_operand.hbm [shape: f32[2,8,128], index: 6, kind: output, shape index: {}]  }
   0x1   :  { %1701 = sst [smem:[#allocation13_spill]] %s1694_s4 }
   0x2   :  { %11 = vsyncpa [#allocation5], 0 }
   0x3   :  { %13 = vsyncpa [#allocation5 + $0x1], 0 }
   0x4   :  { %14 = vsyncpa [#allocation8], 0 }
   0x5   :  { %15 = vsyncpa [#allocation6], 0 }
   0x6   :  { %17 = vsyncpa [#allocation6 + $0x1], 0  ;;  %s1368_s21 = smov 0   ;;  %s1370_s22 = smov 0  }
   0x7   :  { %s1372_s23 = smov 0   ;;  %s1374_s24 = smov 0  }
   0x8   :  { %s1376_s25 = smov 0   ;;  %s1378_s26 = smov 0  }
   0x9 LB: > { %s944_s27 = sadd.s32 4294967295, %s1321_s26   ;;  %s945_s28 = sadd.s32 4294967294, %s1321_s26   ;;  %s1321_s26 = sphi %s1378_s26, %s23_s26   ;;  %s1317_s25 = sphi %s1376_s25, %s1722_s25   ;;  %s1313_s24 = sphi %s1374_s24, %s1721_s24   ;;  %s1309_s23 = sphi %s1372_s23, %s1720_s23   ;;  %s1305_s22 = sphi %s1370_s22, %s1719_s22   ;;  %s1301_s21 = sphi %s1368_s21, %s1718_s21  }
   0xa   : > { %p57_p0 = scmp.ne.s32.totalorder %s1305_s22, %s1301_s21  ;;  %p1402_p1 = scmp.eq.s32.totalorder %s944_s27, 0 }
   0xb   : > { %p1406_p2 = scmp.eq.s32.totalorder %s944_s27, 1  ;;  %p197_p3 = scmp.eq.s32.totalorder %s945_s28, 1 }
   0xc   : > { %s1702_s29 = scalar_select %p1402_p1, 1, 0 }
   0xd   : > { %s1703_s30 = scalar_select %p1406_p2, 1, 0 }
   0xe   : > { %p1412_p4 = por %p1402_p1, %p57_p0  ;;  %p946_p5 = scmp.ge.s32.totalorder %s1321_s26, 1 }
   0xf   : > { %p1417_p6 = por %p197_p3, %p57_p0  ;;  %p204_p7 = scmp.lt.s32.totalorder %s1321_s26, 3 }
  0x10   : > { %s1704_s7 = scalar_select %p1412_p4, 1, 0 }
  0x11   : > { %s1705_s8 = scalar_select %p1417_p6, 1, 0 }
  0x12   : > { %p1422_p8 = pnand %p946_p5, %p204_p7  ;;  %s1323_s10 = smov [#allocation7]  }
  0x13   : > { %s229_s11 = sshll.u32 %s1323_s10, 4  ;;  %s35_s13 = sadd.s32 1, %s1317_s25  ;;  %s230_s11 = int_to_ptr.vmem [resolvable:$true] %s229_s11 }
  0x14   : > { %s1706_s9 = scalar_select %p1422_p8, 1, 0 }
  0x15   : > { %p1096_p9 = pneg %p1422_p8  ;;  %s1708_s4 = sld [smem:[#allocation13_spill]] }
  0x17   : > { %p1431_p11 = pnand %p1096_p9, %p1402_p1 }
  0x19   : > { %p1179_p13 = pneg %p1431_p11 }
  0x1b   : > { %s1177_s16 = scalar_lea.hbm %s1708_s4, 2048 }
  0x1c   : > { %p1178_p12 = scmp.ne.s32.totalorder %s1708_s4, %s1177_s16  ;;  %p1184_p5 = scmp.lt.u32.totalorder %s1177_s16, %s1708_s4 }
  0x1e   : > { %p1180_p0 = pnand %p1179_p13, %p1178_p12 }
  0x20   : > { %p1181_p3 = pneg %p1180_p0 }
  0x22   : > { %p1186_p7 = pnand %p1184_p5, %p1181_p3 }
  0x24   : > { %1189 = shalt.err (!%p1186_p7)
}
  0x25   : > { %s1190_s27 = scalar_lea.vmem %s230_s11, 2048  ;;  %p1198_p1 = scmp.lt.s32.totalorder %s230_s11, %s230_s11 }
  0x26   : > { %p1191_p9 = scmp.ne.s32.totalorder %s230_s11, %s1190_s27  ;;  %p1199_p4 = scmp.lt.s32.totalorder %s1190_s27, %s1190_s27 }
  0x28   : > { %p1193_p10 = pnand %p1191_p9, %p1179_p13  ;;  %p1200_p8 = por %p1199_p4, %p1198_p1 }
  0x2a   : > { %p1194_p6 = pneg %p1193_p10 }
  0x2c   : > { %p1201_p2 = pnand %p1200_p8, %p1194_p6 }
  0x2e   : > { %1204 = shalt.err (!%p1201_p2)
}
  0x2f   : > { %s1324_s28 = smov 128   ;;  %s1325_s10 = smov 8  }
  0x30   : > { %1099 = dma.hbm_to_vmem [thread:$0]  (!%p1431_p11), %s1708_s4, 2048, %s230_s11, [#allocation8], %s1324_s28, %s1324_s28, %s1325_s10  }
  0x31   : > { %p37_p1 = scmp.ge.s32.totalorder %s35_s13, 2  ;;  %s44_s16 = sadd.s32 1, %s1309_s23 }
  0x32   : > { %p51_p2 = scmp.ne.s32.totalorder %s1309_s23, %s1305_s22  ;;  %p52_p4 = scmp.eq.s32.totalorder %s1321_s26, 0 }
  0x33   : > { %s1724_s13 = smov (%p37_p1, %s35_s13), 0  ;;  %p1710_p8 = scmp.ne.s32.totalorder %s1703_s30, 0 }
  0x34   : > { %p1458_p6 = por %p52_p4, %p51_p2  ;;  %s39_s12 = ssub.s32 %s1317_s25, %s1724_s13 }
  0x35   : > { %p1464_p10 = por %p1710_p8, %p51_p2  ;;  %p1109_p12 = scmp.lt.s32.totalorder %s1321_s26, 2 }
  0x36   : > { %p42_p11 = scmp.eq.s32.totalorder %s39_s12, 0  ;;  %s246_s11 = sand.u32 1, %s1309_s23  }
  0x37   : > { %s950_s19 = sshll.u32 %s246_s11, 3  ;;  %s951_s27 = sshll.u32 %s1317_s25, 7 }
  0x38   : > { %s1473_s20 = scalar_select %p42_p11, %s1309_s23, %s44_s16  }
  0x39   : > { %s1479_s14 = scalar_lea.hbm %s1690_s0, %s951_s27  ;;  %s250_s30 = scalar_lea.vmem [#allocation4], %s950_s19 }
  0x3a   : > { %s258_s15 = sshll.u32 %s250_s30, 4  ;;  %p1485_p13 = pnand %p1109_p12, %p1458_p6  ;;  %s1481_s15 = int_to_ptr.vmem [resolvable:$true] %s258_s15 }
  0x3b   : > { %s247_s16 = scalar_lea.sflag [#allocation5], %s246_s11  ;;  %s1205_s4 = scalar_lea.hbm %s1479_s14, 128 }
  0x3c   : > { %p1206_p0 = scmp.ne.s32.totalorder %s1479_s14, %s1205_s4  ;;  %p1207_p3 = pneg %p1485_p13 }
  0x3d   : > { %s1210_s28 = scalar_lea.hbm %s1690_s0, 256  ;;  %p1211_p9 = scmp.lt.u32.totalorder %s1479_s14, %s1690_s0 }
  0x3e   : > { %p1208_p5 = pnand %p1207_p3, %p1206_p0  ;;  %p1212_p1 = scmp.lt.u32.totalorder %s1210_s28, %s1205_s4 }
  0x3f   : > { %p1214_p4 = scmp.lt.u32.totalorder %s1205_s4, %s1479_s14 }
  0x40   : > { %p1209_p7 = pneg %p1208_p5  ;;  %p1213_p2 = por %p1212_p1, %p1211_p9 }
  0x42   : > { %p1215_p6 = por %p1214_p4, %p1213_p2 }
  0x44   : > { %p1216_p8 = pnand %p1215_p6, %p1209_p7 }
  0x46   : > { %1219 = shalt.err (!%p1216_p8)
}
  0x47   : > { %s1220_s11 = scalar_lea.vmem %s1481_s15, 128  ;;  %s1326_s30 = smov [#allocation4]  }
  0x48   : > { %p1221_p12 = scmp.ne.s32.totalorder %s1481_s15, %s1220_s11  ;;  %s1225_s19 = sshll.u32 %s1326_s30, 4  ;;  %s1226_s19 = int_to_ptr.vmem [resolvable:$false] %s1225_s19 }
  0x49   : > { %s1227_s27 = scalar_lea.vmem %s1226_s19, 256  ;;  %p1228_p5 = scmp.lt.s32.totalorder %s1481_s15, %s1226_s19 }
  0x4a   : > { %p1223_p11 = pnand %p1221_p12, %p1207_p3  ;;  %p1229_p9 = scmp.lt.s32.totalorder %s1227_s27, %s1220_s11 }
  0x4c   : > { %p1224_p0 = pneg %p1223_p11  ;;  %p1230_p1 = por %p1229_p9, %p1228_p5 }
  0x4e   : > { %p1231_p2 = pnand %p1230_p1, %p1224_p0 }
  0x50   : > { %1234 = shalt.err (!%p1231_p2)
}
  0x51   : > { %1103 = dma.hbm_to_vmem [thread:$0]  (!%p1485_p13), %s1479_s14, 128, %s1481_s15, %s247_s16  }
  0x52   : > { %p1713_p7 = scmp.ne.s32.totalorder %s1706_s9, 0 }
  0x53   : > { %s1517_s4 = sand.u32 (!%p1713_p7), 1, %s1305_s22   ;;  %p1714_p3 = scmp.ne.s32.totalorder (!%p1713_p7), %s1704_s7, 0 }
  0x54   : > { %267 = sbr.rel (%p1713_p7) target bundleno = 1082 (0x43a), region = 44  ;;  %s953_s28 = sshll.u32 (!%p1713_p7), %s1517_s4, 3 }
  0x55   : > { %s270_s17 = scalar_lea.sflag (!%p1713_p7), [#allocation5], %s1517_s4  ;;  %s273_s10 = scalar_lea.vmem (!%p1713_p7), [#allocation4], %s953_s28 }
  0x5b   : > { %1288 = dma.done.wait (%p1714_p3), %s270_s17, 128  }
  0x5c   : > { %1290 = vsyncadd (%p1714_p3), %s270_s17, 4294967168  ;;  %p1715_p13 = scmp.ne.s32.totalorder %s1702_s29, 0 }
  0x5e   : > { %1292 = dma.done.wait (%p1715_p13), [#allocation8], 2048  }
  0x5f   : > { %1294 = vsyncadd (%p1715_p13), [#allocation8], 4294965248  ;;  %v1327_v0 = vmov 0.0   ;;  %vm1328_vm0 = vmmov 0   ;;  %v1329_v1 = vmov 0   ;;  %v1169_v2 = vld [vmem:[%s1692_s2] sm:$0xff]   ;;  %v407_v16 = vlaneseq }
  0x60   : > { %1002 = vmatprep.subr.bf16.mxu0 %v1327_v0  ;;  %1006 = vmatprep.mubr.msk.bf16.mxu0 %vm1328_vm0, %v1327_v0  ;;  %v1170_v3 = vld [vmem:[%s1692_s2 + $0x8] sm:$0xff]   ;;  %v409_v5 = vld [vmem:[%s1691_s1] sm:$0xff]  ;;  %vm363_vm1 = vcmask 261120   ;;  %vm319_vm2 = vcmask 57344   ;;  %vm321_vm3 = vcmask 64512   ;;  %vm485_vm5 = vcmask 1043456  }
  0x61   : > { %1168 = vset.pattern.permute.xlu0 %v1329_v1  ;;  %1003 = vmatpush3.bf16.msra.mxu0 %v1169_v2  ;;  %v338_v4 = vld [vmem:[%s273_s10] sm:$0xff]  ;;  %v1330_v7 = vmov -1e+30   ;;  %322 = vst.msk [vmem:[#allocation3] sm:$0xff] %vm321_vm3, %v1327_v0  ;;  %323 = vst.msk [vmem:[#allocation3 + $0x8] sm:$0xff] %vm321_vm3, %v1327_v0  ;;  %v408_v18 = vand.u32 127, %v407_v16 }
  0x62   : > { %1004 = vmatprep.subr.bf16.mxu0 %v1327_v0  ;;  %411 = vperm.xlu0 %1168, %v409_v5   ;;  %v339_v6 = vpack.c.bf16 %v338_v4, %v338_v4  ;;  %320 = vst.msk [vmem:[#allocation2] sm:$0x1] %vm319_vm2, %v1330_v7  ;;  %v956_v8 = vld [vmem:[%s1693_s3] ss:$0 sm:$0xff]  ;;  %v1583_v25 = vshrl.u32 %v407_v16, 7  ;;  %v700_v50 = vld [vmem:[#allocation7] sm:$0xff] }
  0x63   : > { %324 = vst.msk [vmem:[#allocation3 + $0x10] sm:$0xff] %vm321_vm3, %v1327_v0  ;;  %325 = vst.msk [vmem:[#allocation3 + $0x18] sm:$0xff] %vm321_vm3, %v1327_v0  ;;  %v701_v51 = vld [vmem:[#allocation7 + $0x8] sm:$0xff]  ;;  %v702_v52 = vld [vmem:[#allocation7 + $0x10] sm:$0xff]  ;;  %v1331_v53 = vmov 0.0|0.0   ;;  %s970_s27 = sshll.u32 %s1313_s24, 7 }
  0x64   : > { %326 = vst.msk [vmem:[#allocation3 + $0x20] sm:$0xff] %vm321_vm3, %v1327_v0  ;;  %327 = vst.msk [vmem:[#allocation3 + $0x28] sm:$0xff] %vm321_vm3, %v1327_v0  ;;  %v436_v29 = vsub.s32 0, %v1583_v25  ;;  %v1064_v54 = vpack.c.bf16 %v701_v51, %v700_v50  ;;  %v703_v55 = vld [vmem:[#allocation7 + $0x18] sm:$0xff]  ;;  %v704_v57 = vld [vmem:[#allocation7 + $0x20] sm:$0xff]  ;;  %s309_s17 = scalar_lea.vmem [#allocation9], %s953_s28  ;;  %s1641_s7 = scalar_lea.hbm %s1696_s6, %s970_s27 }
  0x65   : > { %1005 = vmatpush3.bf16.msra.mxu0 %v1170_v3  ;;  %328 = vst.msk [vmem:[#allocation3 + $0x30] sm:$0xff] %vm321_vm3, %v1327_v0  ;;  %329 = vst.msk [vmem:[#allocation3 + $0x38] sm:$0xff] %vm321_vm3, %v1327_v0  ;;  %v1067_v56 = vpack.c.bf16 %v703_v55, %v702_v52  ;;  %v705_v58 = vld [vmem:[#allocation7 + $0x28] sm:$0xff]  ;;  %v706_v60 = vld [vmem:[#allocation7 + $0x30] sm:$0xff]  ;;  %s840_s10 = sshll.u32 %s309_s17, 4  ;;  %s827_s15 = scalar_lea.sflag [#allocation6], %s1517_s4  ;;  %s1643_s10 = int_to_ptr.vmem [resolvable:$true] %s840_s10 }
  0x66   : > { %330 = vst.msk [vmem:[#allocation3 + $0x40] sm:$0xff] %vm321_vm3, %v1327_v0  ;;  %331 = vst.msk [vmem:[#allocation3 + $0x48] sm:$0xff] %vm321_vm3, %v1327_v0  ;;  %v1070_v59 = vpack.c.bf16 %v705_v58, %v704_v57  ;;  %v707_v61 = vld [vmem:[#allocation7 + $0x38] sm:$0xff]  ;;  %v708_v63 = vld [vmem:[#allocation7 + $0x40] sm:$0xff]  ;;  %s1235_s29 = scalar_lea.vmem %s1643_s10, 128  ;;  %s1332_s24 = smov [#allocation9]  }
  0x67   : > { %332 = vst.msk [vmem:[#allocation3 + $0x50] sm:$0xff] %vm321_vm3, %v1327_v0  ;;  %333 = vst.msk [vmem:[#allocation3 + $0x58] sm:$0xff] %vm321_vm3, %v1327_v0  ;;  %v1073_v62 = vpack.c.bf16 %v707_v61, %v706_v60  ;;  %v710_v2 = vld [vmem:[#allocation7 + $0x50] sm:$0xff]  ;;  %v711_v3 = vld [vmem:[#allocation7 + $0x58] sm:$0xff]  ;;  %v682_v61 = vsub.s32 1, %v1583_v25  ;;  %p1236_p4 = scmp.ne.s32.totalorder %s1643_s10, %s1235_s29  ;;  %s1239_s28 = sshll.u32 %s1332_s24, 4  ;;  %s1240_s28 = int_to_ptr.vmem [resolvable:$false] %s1239_s28 }
  0x68   : > { %1007 = vmatmul.mubr.msk.bf16.vlgmr.msra.gmra.mrb[0].mxu0 %vm363_vm1, %v339_v6  ;;  %334 = vst.msk [vmem:[#allocation3 + $0x60] sm:$0xff] %vm321_vm3, %v1327_v0  ;;  %335 = vst.msk [vmem:[#allocation3 + $0x68] sm:$0xff] %vm321_vm3, %v1327_v0  ;;  %v1079_v4 = vpack.c.bf16 %v711_v3, %v710_v2  ;;  %v712_v5 = vld [vmem:[#allocation7 + $0x60] sm:$0xff]  ;;  %v713_v6 = vld [vmem:[#allocation7 + $0x68] sm:$0xff]  ;;  %s1241_s12 = scalar_lea.vmem %s1240_s28, 256  ;;  %p1242_p12 = scmp.lt.s32.totalorder %s1643_s10, %s1240_s28 }
  0x69   : > { %336 = vst.msk [vmem:[#allocation3 + $0x70] sm:$0xff] %vm321_vm3, %v1327_v0  ;;  %337 = vst.msk [vmem:[#allocation3 + $0x78] sm:$0xff] %vm321_vm3, %v1327_v0  ;;  %v420_v28 = vld [vmem:[#allocation2] sm:$0x1]  ;;  %v1082_v7 = vpack.c.bf16 %v713_v6, %v712_v5  ;;  %p1237_p6 = pnand %p1236_p4, %p1464_p10  ;;  %p1243_p11 = scmp.lt.s32.totalorder %s1241_s12, %s1235_s29 }
  0x6b   : > { %p1238_p8 = pneg %p1237_p6  ;;  %p1244_p0 = por %p1243_p11, %p1242_p12 }
  0x6d   : > { %v595_v50 = vld [vmem:[#allocation3 + $0x48] sm:$0xff]  ;;  %p1245_p5 = pnand %p1244_p0, %p1238_p8 }
  0x70   : > { %v601_v2 = vld [vmem:[#allocation3 + $0x78] sm:$0xff] }
  0xe1   : > { %v412_v17 = vpop.permute.xlu0 %411 }
  0xe2   : > { %vm413_vm4 = vcmp.eq.s32.totalorder %v408_v18, %v412_v17 }
 0x13b   : > { %v401_v9 = vpop.f32.mrb[0].mxu0 }
 0x13c   : > { %v402_v10 = vadd.f32 %v956_v8, %v401_v9  ;;  %v1008_v11 = vpop.f32.mrb[1].mxu0  ;;  %v714_v8 = vld [vmem:[#allocation7 + $0x70] sm:$0xff]  ;;  %v715_v9 = vld [vmem:[#allocation7 + $0x78] sm:$0xff] }
 0x13d   : > { %v404_v12 = vpop.f32.mrb[2].mxu0  ;;  %v588_v11 = vld [vmem:[#allocation3 + $0x10] sm:$0xff] }
 0x13e   : > { %416 = vperm.xlu0 %1168, %v402_v10   ;;  %v1009_v13 = vpop.f32.mrb[3].mxu0  ;;  %v443_v14 = vpack.c.bf16 %v402_v10, %v402_v10  ;;  %v1085_v10 = vpack.c.bf16 %v715_v9, %v714_v8  ;;  %v586_v12 = vld [vmem:[#allocation3] sm:$0xff] }
 0x13f   : > { %v589_v13 = vld [vmem:[#allocation3 + $0x18] sm:$0xff] }
 0x140   : > { %445 = vxpose.xlu1.c.b16.start.end [1/1] (short) %v443_v14, 128 }
 0x1a6   : > { %v453_v15 = vpop.trf.xlu1 }
 0x1a7   : > { %1012 = vmatprep.mubr.msk.bf16.mxu1 %vm321_vm3, %v453_v15  ;;  %v587_v15 = vld [vmem:[#allocation3 + $0x8] sm:$0xff] }
 0x1aa   : > { %v454_v37 = vpop.trf.xlu1 }
 0x1ae   : > { %v455_v40 = vpop.trf.xlu1 }
 0x1b2   : > { %v456_v45 = vpop.trf.xlu1 }
 0x1b6   : > { %v457_v46 = vpop.trf.xlu1 }
 0x1ba   : > { %v458_v47 = vpop.trf.xlu1 }
 0x1bd   : > { %v417_v19 = vpop.permute.xlu0 %416 }
 0x1be   : > { %v419_v20 = vsel %vm413_vm4, %v417_v19, -1e+30  ;;  %v459_v48 = vpop.trf.xlu1 }
 0x1bf   : > { %v422_v21 = vsel %vm321_vm3, %v419_v20, -inf }
 0x1c0   : > { %v423_v22 = vrot.slane %v422_v21, 4 }
 0x1c2   : > { %v424_v23 = vmax.f32 %v422_v21, %v423_v22  ;;  %v460_v49 = vpop.trf.xlu1 }
 0x1c4   : > { %v425_v24 = vrot.slane %v424_v23, 2 }
 0x1c6   : > { %v426_v26 = vmax.f32 %v424_v23, %v425_v24 }
 0x1c8   : > { %v427_v27 = vrot.slane %v426_v26, 1 }
 0x1ca   : > { %v428_v30 = vmax.f32 %v426_v26, %v427_v27 }
 0x1cc   : > { %v429_v31 = vmax.f32 %v420_v28, %v428_v30  ;;  %v593_v30 = vld [vmem:[#allocation3 + $0x38] sm:$0xff] }
 0x1ce   : > { %v430_v32 = vsub.f32 %v420_v28, %v429_v31  ;;  %v437_v33 = vrot.slane %v429_v31, %v436_v29  ;;  %657 = vst.msk [vmem:[#allocation2] sm:$0x1] %vm319_vm2, %v429_v31  ;;  %v592_v28 = vld [vmem:[#allocation3 + $0x30] sm:$0xff] }
 0x1d0   : > { %v431_v34 = vmul.f32 1.442695, %v430_v32  ;;  %v439_v35 = vsub.f32 %v419_v20, %v437_v33  ;;  %v591_v32 = vld [vmem:[#allocation3 + $0x28] sm:$0xff] }
 0x1d2   : > { %1171 = vpow2.f32 %v431_v34  ;;  %v440_v36 = vmul.f32 1.442695, %v439_v35 }
 0x1d4   : > { %1173 = vpow2.f32 %v440_v36 }
 0x1dc   : > { %v1172_v38 = vpop.eup %1171 }
 0x1dd   : > { %v1587_v39 = vrot.slane %v1172_v38, %v436_v29  ;;  %v590_v29 = vld [vmem:[#allocation3 + $0x20] sm:$0xff] }
 0x1de   : > { %v1174_v41 = vpop.eup %1173 }
 0x1df   : > { %v442_v42 = vsel %vm413_vm4, %v1174_v41, 0.0  ;;  %v610_v14 = vmul.f32 %v1587_v39, %v588_v11  ;;  %v608_v17 = vmul.f32 %v1587_v39, %v586_v12  ;;  %v611_v20 = vmul.f32 %v1587_v39, %v589_v13 }
 0x1e0   : > { %v444_v43 = vpack.c.bf16 %v442_v42, %v442_v42  ;;  %v609_v23 = vmul.f32 %v1587_v39, %v587_v15  ;;  %v614_v31 = vmul.f32 %v1587_v39, %v592_v28  ;;  %v612_v34 = vmul.f32 %v1587_v39, %v590_v29 }
 0x1e1   : > { %v613_v41 = vmul.f32 %v1587_v39, %v591_v32  ;;  %v617_v58 = vmul.f32 %v1587_v39, %v595_v50  ;;  %v968_v50 = vld [vmem:[%s1695_s5] ss:$0 sm:$0xff] }
 0x1e2   : > { %1087 = vmatprep.subr.msk.bf16.mxu1 %vm485_vm5, %v444_v43  ;;  %v487_v44 = vsel %vm485_vm5, %v444_v43, 0 }
 0x1e3   : > { %1011 = vmatpush3.bf16.msra.mxu1 %v487_v44 }
 0x1e4   : > { %1063 = vmatprep.subr.bf16.mxu1 %v1331_v53 }
 0x1e6   : > { %1013 = vmatmul.mubr.msk.bf16.vlgmr.msra.gmra.mrb[0].mxu1 %vm321_vm3, %v454_v37  ;;  %v615_v37 = vmul.f32 %v1587_v39, %v593_v30 }
 0x1e7   : > { %1016 = vmatprep.mubr.msk.bf16.mxu1 %vm321_vm3, %v455_v40  ;;  %1065 = vmatpush3.bf16.msra.mxu1 %v1064_v54 }
 0x1e8   : > { %1066 = vmatprep.subr.bf16.mxu1 %v1331_v53 }
 0x1eb   : > { %1068 = vmatpush3.bf16.msra.mxu1 %v1067_v56 }
 0x1ec   : > { %1069 = vmatprep.subr.bf16.mxu1 %v1331_v53 }
 0x1ee   : > { %1017 = vmatmul.mubr.msk.bf16.gmra.mrb[4].mxu1 %vm321_vm3, %v456_v45 }
 0x1ef   : > { %1020 = vmatprep.mubr.msk.bf16.mxu1 %vm321_vm3, %v457_v46  ;;  %1071 = vmatpush3.bf16.msra.mxu1 %v1070_v59  ;;  %v596_v46 = vld [vmem:[#allocation3 + $0x50] sm:$0xff] }
 0x1f0   : > { %1072 = vmatprep.subr.bf16.mxu1 %v1331_v53 }
 0x1f3   : > { %1074 = vmatpush3.bf16.msra.mxu1 %v1073_v62 }
 0x1f4   : > { %1075 = vmatprep.subr.bf16.mxu1 %v1331_v53 }
 0x1f6   : > { %1021 = vmatmul.mubr.msk.bf16.gmra.mrb[8].mxu1 %vm321_vm3, %v458_v47  ;;  %v594_v47 = vld [vmem:[#allocation3 + $0x40] sm:$0xff] }
 0x1f7   : > { %1024 = vmatprep.mubr.msk.bf16.mxu1 %vm321_vm3, %v459_v48  ;;  %v597_v48 = vld [vmem:[#allocation3 + $0x58] sm:$0xff]  ;;  %v616_v52 = vmul.f32 %v1587_v39, %v594_v47 }
 0x1f8   : > { %v619_v55 = vmul.f32 %v1587_v39, %v597_v48 }
 0x1fe   : > { %1025 = vmatmul.mubr.msk.bf16.gmra.mrb[12].mxu1 %vm321_vm3, %v460_v49  ;;  %v618_v49 = vmul.f32 %v1587_v39, %v596_v46 }
 0x1ff   : > { %1060 = vmatprep.mubr.msk.f32.mxu1 %vm1328_vm0, %v1327_v0  ;;  %v709_v0 = vld [vmem:[#allocation7 + $0x48] sm:$0xff] }
 0x200   : > { %v1076_v1 = vpack.c.bf16 %v709_v0, %v708_v63  ;;  %v600_v63 = vld [vmem:[#allocation3 + $0x70] sm:$0xff]  ;;  %v598_v0 = vld [vmem:[#allocation3 + $0x60] sm:$0xff] }
 0x201   : > { %v622_v3 = vmul.f32 %v1587_v39, %v600_v63 }
 0x202   : > { %1077 = vmatpush3.bf16.msra.mxu1 %v1076_v1 }
 0x203   : > { %1078 = vmatprep.subr.bf16.mxu1 %v1331_v53 }
 0x206   : > { %1080 = vmatpush3.bf16.msra.mxu1 %v1079_v4  ;;  %v599_v4 = vld [vmem:[#allocation3 + $0x68] sm:$0xff] }
 0x207   : > { %1081 = vmatprep.subr.bf16.mxu1 %v1331_v53  ;;  %v621_v13 = vmul.f32 %v1587_v39, %v599_v4 }
 0x20a   : > { %1083 = vmatpush3.bf16.msra.mxu1 %v1082_v7  ;;  %v620_v7 = vmul.f32 %v1587_v39, %v598_v0 }
 0x20b   : > { %1084 = vmatprep.subr.bf16.mxu1 %v1331_v53 }
 0x20e   : > { %1086 = vmatpush3.bf16.msra.mxu1 %v1085_v10  ;;  %v623_v10 = vmul.f32 %v1587_v39, %v601_v2 }
 0x2b9   : > { %v1014_v16 = vpop.f32.mrb[0].mxu1 }
 0x2ba   : > { %v626_v18 = vadd.f32 %v1014_v16, %v610_v14  ;;  %v523_v19 = vpop.f32.mrb[1].mxu1 }
 0x2bb   : > { %v624_v21 = vadd.f32 %v608_v17, %v523_v19  ;;  %v1015_v22 = vpop.f32.mrb[2].mxu1 }
 0x2bc   : > { %642 = vst.msk [vmem:[#allocation3 + $0x10] sm:$0xff] %vm321_vm3, %v626_v18  ;;  %v627_v24 = vadd.f32 %v1015_v22, %v611_v20  ;;  %v526_v26 = vpop.f32.mrb[3].mxu1 }
 0x2bd   : > { %640 = vst.msk [vmem:[#allocation3] sm:$0xff] %vm321_vm3, %v624_v21  ;;  %v625_v27 = vadd.f32 %v609_v23, %v526_v26 }
 0x2be   : > { %643 = vst.msk [vmem:[#allocation3 + $0x18] sm:$0xff] %vm321_vm3, %v627_v24 }
 0x2bf   : > { %641 = vst.msk [vmem:[#allocation3 + $0x8] sm:$0xff] %vm321_vm3, %v625_v27 }
 0x2c1   : > { %v1018_v33 = vpop.f32.mrb[4].mxu1 }
 0x2c2   : > { %v630_v35 = vadd.f32 %v1018_v33, %v614_v31  ;;  %v539_v36 = vpop.f32.mrb[5].mxu1 }
 0x2c3   : > { %v628_v38 = vadd.f32 %v612_v34, %v539_v36  ;;  %v1019_v40 = vpop.f32.mrb[6].mxu1  ;;  %v663_v20 = vld [vmem:[#allocation3 + $0x10] sm:$0xff] }
 0x2c4   : > { %646 = vst.msk [vmem:[#allocation3 + $0x30] sm:$0xff] %vm321_vm3, %v630_v35  ;;  %v631_v42 = vadd.f32 %v1019_v40, %v615_v37  ;;  %v542_v43 = vpop.f32.mrb[7].mxu1  ;;  %v661_v44 = vld [vmem:[#allocation3] sm:$0xff] }
 0x2c5   : > { %644 = vst.msk [vmem:[#allocation3 + $0x20] sm:$0xff] %vm321_vm3, %v628_v38  ;;  %v629_v45 = vadd.f32 %v613_v41, %v542_v43  ;;  %1175 = vrcp.f32 %v661_v44  ;;  %vm677_vm6 = vcmp.gt.f32.partialorder %v661_v44, 0.0  ;;  %v664_v39 = vld [vmem:[#allocation3 + $0x18] sm:$0xff] }
 0x2c6   : > { %647 = vst.msk [vmem:[#allocation3 + $0x38] sm:$0xff] %vm321_vm3, %v631_v42  ;;  %v662_v18 = vld [vmem:[#allocation3 + $0x8] sm:$0xff] }
 0x2c7   : > { %645 = vst.msk [vmem:[#allocation3 + $0x28] sm:$0xff] %vm321_vm3, %v629_v45 }
 0x2c9   : > { %v1022_v51 = vpop.f32.mrb[8].mxu1 }
 0x2ca   : > { %v634_v53 = vadd.f32 %v1022_v51, %v618_v49  ;;  %v555_v54 = vpop.f32.mrb[9].mxu1 }
 0x2cb   : > { %v632_v56 = vadd.f32 %v616_v52, %v555_v54  ;;  %v1023_v57 = vpop.f32.mrb[10].mxu1  ;;  %v667_v28 = vld [vmem:[#allocation3 + $0x30] sm:$0xff] }
 0x2cc   : > { %650 = vst.msk [vmem:[#allocation3 + $0x50] sm:$0xff] %vm321_vm3, %v634_v53  ;;  %v635_v59 = vadd.f32 %v1023_v57, %v619_v55  ;;  %v558_v60 = vpop.f32.mrb[11].mxu1  ;;  %v665_v23 = vld [vmem:[#allocation3 + $0x20] sm:$0xff] }
 0x2cd   : > { %648 = vst.msk [vmem:[#allocation3 + $0x40] sm:$0xff] %vm321_vm3, %v632_v56  ;;  %v633_v62 = vadd.f32 %v617_v58, %v558_v60  ;;  %v668_v30 = vld [vmem:[#allocation3 + $0x38] sm:$0xff] }
 0x2ce   : > { %651 = vst.msk [vmem:[#allocation3 + $0x58] sm:$0xff] %vm321_vm3, %v635_v59  ;;  %v666_v26 = vld [vmem:[#allocation3 + $0x28] sm:$0xff] }
 0x2cf   : > { %v1176_v1 = vpop.eup %1175  ;;  %649 = vst.msk [vmem:[#allocation3 + $0x48] sm:$0xff] %vm321_vm3, %v633_v62 }
 0x2d0   : > { %v679_v5 = vsel %vm677_vm6, %v1176_v1, 0.0 }
 0x2d1   : > { %v1026_v6 = vpop.f32.mrb[12].mxu1  ;;  %v683_v25 = vrot.slane %v679_v5, %v682_v61 }
 0x2d2   : > { %v638_v8 = vadd.f32 %v1026_v6, %v622_v3  ;;  %v571_v9 = vpop.f32.mrb[13].mxu1 }
 0x2d3   : > { %v636_v11 = vadd.f32 %v620_v7, %v571_v9  ;;  %v1027_v12 = vpop.f32.mrb[14].mxu1  ;;  %v684_v14 = vmul.f32 %v683_v25, %v661_v44  ;;  %v685_v19 = vmul.f32 %v683_v25, %v662_v18  ;;  %v686_v21 = vmul.f32 %v683_v25, %v663_v20  ;;  %v671_v36 = vld [vmem:[#allocation3 + $0x50] sm:$0xff] }
 0x2d4   : > { %654 = vst.msk [vmem:[#allocation3 + $0x70] sm:$0xff] %vm321_vm3, %v638_v8  ;;  %v639_v15 = vadd.f32 %v1027_v12, %v623_v10  ;;  %v574_v16 = vpop.f32.mrb[15].mxu1  ;;  %v687_v22 = vmul.f32 %v683_v25, %v664_v39  ;;  %v688_v24 = vmul.f32 %v683_v25, %v665_v23  ;;  %v689_v27 = vmul.f32 %v683_v25, %v666_v26  ;;  %v669_v32 = vld [vmem:[#allocation3 + $0x40] sm:$0xff] }
 0x2d5   : > { %652 = vst.msk [vmem:[#allocation3 + $0x60] sm:$0xff] %vm321_vm3, %v636_v11  ;;  %v637_v17 = vadd.f32 %v621_v13, %v574_v16  ;;  %723 = vxpose.xlu1.b32.start [1/16] (narrow) %v684_v14, 8  ;;  %v690_v29 = vmul.f32 %v683_v25, %v667_v28  ;;  %v691_v31 = vmul.f32 %v683_v25, %v668_v30  ;;  %v672_v38 = vld [vmem:[#allocation3 + $0x58] sm:$0xff] }
 0x2d6   : > { %655 = vst.msk [vmem:[#allocation3 + $0x78] sm:$0xff] %vm321_vm3, %v639_v15  ;;  %v692_v33 = vmul.f32 %v683_v25, %v669_v32  ;;  %v670_v34 = vld [vmem:[#allocation3 + $0x48] sm:$0xff]  ;;  %v694_v37 = vmul.f32 %v683_v25, %v671_v36  ;;  %v695_v40 = vmul.f32 %v683_v25, %v672_v38 }
 0x2d7   : > { %653 = vst.msk [vmem:[#allocation3 + $0x68] sm:$0xff] %vm321_vm3, %v637_v17  ;;  %v693_v35 = vmul.f32 %v683_v25, %v670_v34 }
 0x2d9   : > { %724 = vxpose.xlu1.b32.cont [2/16] (narrow) %v685_v19, 8 }
 0x2db   : > { %v675_v45 = vld [vmem:[#allocation3 + $0x70] sm:$0xff] }
 0x2dc   : > { %v673_v41 = vld [vmem:[#allocation3 + $0x60] sm:$0xff]  ;;  %v698_v46 = vmul.f32 %v683_v25, %v675_v45 }
 0x2dd   : > { %725 = vxpose.xlu1.b32.cont [3/16] (narrow) %v686_v21, 8  ;;  %v696_v42 = vmul.f32 %v683_v25, %v673_v41  ;;  %v676_v47 = vld [vmem:[#allocation3 + $0x78] sm:$0xff] }
 0x2de   : > { %v674_v43 = vld [vmem:[#allocation3 + $0x68] sm:$0xff]  ;;  %v699_v48 = vmul.f32 %v683_v25, %v676_v47 }
 0x2df   : > { %v697_v44 = vmul.f32 %v683_v25, %v674_v43 }
 0x2e1   : > { %726 = vxpose.xlu1.b32.cont [4/16] (narrow) %v687_v22, 8 }
 0x2e5   : > { %727 = vxpose.xlu1.b32.cont [5/16] (narrow) %v688_v24, 8 }
 0x2e9   : > { %728 = vxpose.xlu1.b32.cont [6/16] (narrow) %v689_v27, 8 }
 0x2ed   : > { %729 = vxpose.xlu1.b32.cont [7/16] (narrow) %v690_v29, 8 }
 0x2f1   : > { %730 = vxpose.xlu1.b32.cont [8/16] (narrow) %v691_v31, 8 }
 0x2f5   : > { %731 = vxpose.xlu1.b32.cont [9/16] (narrow) %v692_v33, 8 }
 0x2f9   : > { %732 = vxpose.xlu1.b32.cont [10/16] (narrow) %v693_v35, 8 }
 0x2fd   : > { %733 = vxpose.xlu1.b32.cont [11/16] (narrow) %v694_v37, 8 }
 0x301   : > { %734 = vxpose.xlu1.b32.cont [12/16] (narrow) %v695_v40, 8 }
 0x305   : > { %735 = vxpose.xlu1.b32.cont [13/16] (narrow) %v696_v42, 8 }
 0x309   : > { %736 = vxpose.xlu1.b32.cont [14/16] (narrow) %v697_v44, 8 }
 0x30d   : > { %737 = vxpose.xlu1.b32.cont [15/16] (narrow) %v698_v46, 8 }
 0x311   : > { %738 = vxpose.xlu1.b32.end [16/16] (narrow) %v699_v48, 8 }
 0x355   : > { %v739_v49 = vpop.trf.xlu1 }
 0x356   : > { %1061 = vmatmul.mubr.f32.vlgmr.msra.gmra.mrb[16].mxu1 %v739_v49 }
 0x429   : > { %v821_v51 = vpop.f32.mrb[16].mxu1 }
 0x42a   : > { %v822_v52 = vadd.f32 %v968_v50, %v821_v51  ;;  %v1062_v53 = vpop.f32.mrb[17].mxu1 }
 0x42c   : > { %825 = vst [vmem:[%s309_s17] sm:$0xff] %v822_v52 }
 0x42d   : > { %1248 = shalt.err (!%p1245_p5)
}
 0x42e   : > { %s1249_s4 = scalar_lea.hbm %s1641_s7, 128  ;;  %s1253_s30 = scalar_lea.hbm %s1696_s6, 256 }
 0x42f   : > { %p1250_p9 = scmp.ne.s32.totalorder %s1641_s7, %s1249_s4  ;;  %p1254_p7 = scmp.lt.u32.totalorder %s1641_s7, %s1696_s6 }
 0x430   : > { %p1255_p3 = scmp.lt.u32.totalorder %s1253_s30, %s1249_s4  ;;  %p1257_p4 = scmp.lt.u32.totalorder %s1249_s4, %s1641_s7 }
 0x431   : > { %p1251_p1 = pnand %p1250_p9, %p1464_p10 }
 0x432   : > { %p1256_p13 = por %p1255_p3, %p1254_p7 }
 0x433   : > { %p1252_p2 = pneg %p1251_p1 }
 0x434   : > { %p1258_p6 = por %p1257_p4, %p1256_p13 }
 0x436   : > { %p1259_p8 = pnand %p1258_p6, %p1252_p2 }
 0x438   : > { %1262 = shalt.err (!%p1259_p8)
}
 0x439   : > { %1094 = dma.vmem_to_hbm [thread:$0]  (%p1464_p10), %s1643_s10, 128, %s1641_s7, %s827_s15  }
 0x43a PF: > { %s852_s17 = sand.u32 1, %s1301_s21   ;;  %p1716_p12 = scmp.ne.s32.totalorder %s1705_s8, 0 }
 0x43b   : > { %p1717_p11 = scmp.ge.s32.totalorder %s1321_s26, 2  ;;  %s853_s9 = scalar_lea.sflag [#allocation6], %s852_s17 }
 0x43d   : > { %p1105_p0 = pnand %p1717_p11, %p1716_p12 }
 0x43f   : > { %1296 = dma.done.wait (!%p1105_p0), %s853_s9, 128  }
 0x440   : > { %1298 = vsyncadd (!%p1105_p0), %s853_s9, 4294967168  ;;  %s23_s26 = sadd.s32 1, %s1321_s26   ;;  %s1718_s21 = smov %s1305_s22 }
 0x441   : > { %p20_p5 = scmp.ge.s32.totalorder %s23_s26, 4   ;;  %s1719_s22 = smov %s1309_s23 }
 0x442   : > { %s1720_s23 = smov %s1473_s20  ;;  %s1721_s24 = smov %s1317_s25 }
 0x443   : > { %s1722_s25 = smov %s1724_s13  ;;  %22 = sbr.rel (!%p20_p5) target bundleno = 9 (0x9), region = 104 }
 0x44a   :  { %858 = vsyncpa [#allocation5], 1 }
 0x44b   :  { %860 = vsyncpa [#allocation5 + $0x1], 1 }
 0x44c   :  { %861 = vsyncpa [#allocation8], 1 }
 0x44d   :  { %862 = vsyncpa [#allocation6], 1 }
 0x44e   :  { %864 = vsyncpa [#allocation6 + $0x1], 1 }

</bundles_post_ra>
